<compile_context>
chip_gen: v5e
topology: v5e:2x2
jax: 0.10.0
libtpu: 0.0.40
codegen_flags: <defaults>
</compile_context>

<pallas_src>
import jax
import jax.numpy as jnp
from jax.experimental import pallas as pl
from jax.experimental.pallas import tpu as pltpu


def _round_up(x, m):
    return ((x + m - 1) // m) * m


def _feat_pad(n):
    # Lane-dense padding only when it pays off: dims <= 128 use full-array
    # blocks; larger misaligned dims round up to a multiple of 128 so stores
    # are unmasked vst and MXU passes are full width.
    return n if n <= 128 else _round_up(n, 128)


def _vmem_limit_bytes():
    # ~15% headroom under physical per-core VMEM (room for Mosaic scratch).
    try:
        cap = getattr(pltpu.get_tpu_info(), "vmem_capacity_bytes",
                      64 * 1024 * 1024)
    except Exception:
        cap = 64 * 1024 * 1024
    return int(cap * 0.85)


def mlp_kernel(x_ref, w1_ref, b1_ref, w2_ref, b2_ref, w3_ref, b3_ref, o_ref):
    # Layer 1: bf16 MXU matmul, f32 accumulate; bias + ReLU in f32.
    h1 = jnp.dot(x_ref[...], w1_ref[...], preferred_element_type=jnp.float32)
    h1 = jnp.maximum(h1 + b1_ref[...], 0.0)
    # Layer 2.
    h2 = jnp.dot(h1.astype(jnp.bfloat16), w2_ref[...],
                 preferred_element_type=jnp.float32)
    h2 = jnp.maximum(h2 + b2_ref[...], 0.0)
    # Layer 3: logits, no activation.
    out = jnp.dot(h2.astype(jnp.bfloat16), w3_ref[...],
                  preferred_element_type=jnp.float32)
    o_ref[...] = (out + b3_ref[...]).astype(o_ref.dtype)


def prepare_params(params):
    """One-time pad + cast of weights/biases.

    Call once and reuse across forward calls: removes 6 pad/convert XLA ops
    and a full extra HBM round-trip over every weight from each forward.
    """
    w1, b1, w2, b2, w3, b3 = (params[k] for k in ("w1", "b1", "w2", "b2", "w3", "b3"))
    in_size, hidden = w1.shape
    num_classes = w3.shape[1]
    IN_P, H_P, C_P = _feat_pad(in_size), _feat_pad(hidden), _feat_pad(num_classes)

    bf16, f32 = jnp.bfloat16, jnp.float32
    prepared = {
        "w1": jnp.pad(w1.astype(bf16), ((0, IN_P - in_size), (0, H_P - hidden))),
        "b1": jnp.pad(b1.astype(f32), ((0, 0), (0, H_P - hidden))),
        "w2": jnp.pad(w2.astype(bf16), ((0, H_P - hidden), (0, H_P - hidden))),
        "b2": jnp.pad(b2.astype(f32), ((0, 0), (0, H_P - hidden))),
        "w3": jnp.pad(w3.astype(bf16), ((0, H_P - hidden), (0, C_P - num_classes))),
        "b3": jnp.pad(b3.astype(f32), ((0, 0), (0, C_P - num_classes))),
        "meta": dict(in_size=in_size, hidden=hidden, num_classes=num_classes,
                     in_p=IN_P, h_p=H_P, c_p=C_P),
    }
    return prepared


def simple_classifier_forward(x, prepared, *, batch_tile=None,
                              out_dtype=jnp.float32):
    """x: (B, input_size) f32.  prepared: output of prepare_params()."""
    meta = prepared["meta"]
    B, in_size = x.shape
    assert in_size == meta["in_size"], "input feature size mismatch"
    IN_P, H_P, C_P = meta["in_p"], meta["h_p"], meta["c_p"]
    num_classes = meta["num_classes"]

    # Batch tile: multiple of 16 (bf16 sublane pair); bigger tile when B is
    # large amortizes the per-grid-step pipeline overhead (weights stay
    # resident, so only the activation tiles grow).
    if batch_tile is None:
        batch_tile = 512 if B >= 2048 else 256
    TB = min(batch_tile, _round_up(B, 16))
    grid = (pl.cdiv(B, TB),)
    num_tiles = grid[0]

    # Cast x to bf16 first; zero-pad only the K/feature dim and only if the
    # prepared weights were padded.  No batch padding (ragged last tile).
    xb = x.astype(jnp.bfloat16)
    if IN_P != in_size:
        xb = jnp.pad(xb, ((0, 0), (0, IN_P - in_size)))

    flops = 2 * B * (IN_P * H_P + H_P * H_P + H_P * C_P)
    bytes_accessed = (
        xb.size * 2
        + (prepared["w1"].size + prepared["w2"].size + prepared["w3"].size) * 2
        + (prepared["b1"].size + prepared["b2"].size + prepared["b3"].size) * 4
        + B * C_P * jnp.dtype(out_dtype).itemsize
    )

    def const_spec(shape, single_buffer):
        # Constant-index blocks never change across the grid: single-buffer
        # them to halve the resident weight VMEM footprint.
        if single_buffer:
            return pl.BlockSpec(shape, lambda i: (0, 0),
                                pipeline_mode=pl.Buffered(1))
        return pl.BlockSpec(shape, lambda i: (0, 0))

    def build(single_buffer_weights):
        return pl.pallas_call(
            mlp_kernel,
            out_shape=jax.ShapeDtypeStruct((B, C_P), out_dtype),
            grid=grid,
            in_specs=[
                pl.BlockSpec((TB, IN_P), lambda i: (i, 0)),      # x: batch-tiled
                const_spec((IN_P, H_P), single_buffer_weights),  # w1 (resident)
                const_spec((1, H_P), single_buffer_weights),     # b1
                const_spec((H_P, H_P), single_buffer_weights),   # w2
                const_spec((1, H_P), single_buffer_weights),     # b2
                const_spec((H_P, C_P), single_buffer_weights),   # w3
                const_spec((1, C_P), single_buffer_weights),     # b3
            ],
            out_specs=pl.BlockSpec((TB, C_P), lambda i: (i, 0)),
            compiler_params=pltpu.CompilerParams(
                # Only shard the batch axis across cores when there is enough
                # work; otherwise each core re-reads the resident weights.
                dimension_semantics=(
                    ("parallel",) if num_tiles >= 4 else ("arbitrary",)),
                vmem_limit_bytes=_vmem_limit_bytes(),
            ),
            cost_estimate=pl.CostEstimate(
                flops=flops, transcendentals=0, bytes_accessed=bytes_accessed),
        )

    args = (xb, prepared["w1"], prepared["b1"], prepared["w2"],
            prepared["b2"], prepared["w3"], prepared["b3"])
    try:
        out = build(True)(*args)
    except Exception:
        # pl.Buffered(1) not supported on this jax/backend combination:
        # fall back to default double-buffered weight blocks.
        out = build(False)(*args)

    return out[:, :num_classes] if C_P != num_classes else out


def init_params(key, input_size, hidden_size, num_classes):
    """PyTorch-style uniform(-1/sqrt(fan_in), 1/sqrt(fan_in)) init."""
    ks = jax.random.split(key, 6)

    def lin(kw, kb, fan_in, fan_out):
        bound = 1.0 / jnp.sqrt(float(fan_in))
        w = jax.random.uniform(kw, (fan_in, fan_out), jnp.float32, -bound, bound)
        b = jax.random.uniform(kb, (1, fan_out), jnp.float32, -bound, bound)
        return w, b

    w1, b1 = lin(ks[0], ks[1], input_size, hidden_size)
    w2, b2 = lin(ks[2], ks[3], hidden_size, hidden_size)
    w3, b3 = lin(ks[4], ks[5], hidden_size, num_classes)
    return {"w1": w1, "b1": b1, "w2": w2, "b2": b2, "w3": w3, "b3": b3}


def reference_forward_bf16(x, params):
    """Mirrors the kernel's numerics: bf16 MXU inputs, f32 accumulation."""
    bf16, f32 = jnp.bfloat16, jnp.float32
    h1 = jnp.dot(x.astype(bf16), params["w1"].astype(bf16),
                 preferred_element_type=f32) + params["b1"]
    h1 = jnp.maximum(h1, 0.0)
    h2 = jnp.dot(h1.astype(bf16), params["w2"].astype(bf16),
                 preferred_element_type=f32) + params["b2"]
    h2 = jnp.maximum(h2, 0.0)
    return jnp.dot(h2.astype(bf16), params["w3"].astype(bf16),
                   preferred_element_type=f32) + params["b3"]


def reference_forward_f32(x, params):
    h1 = jnp.maximum(x @ params["w1"] + params["b1"], 0.0)
    h2 = jnp.maximum(h1 @ params["w2"] + params["b2"], 0.0)
    return h2 @ params["w3"] + params["b3"]


if __name__ == "__main__":
    batch = 8
    input_size = 32
    hidden_size = 32
    num_classes = 8

    key = jax.random.PRNGKey(0)
    k_x, k_p = jax.random.split(key)
    x = jax.random.normal(k_x, (batch, input_size), jnp.float32)
    params = init_params(k_p, input_size, hidden_size, num_classes)

    prepared = prepare_params(params)        # one-time weight pad/cast
    out = simple_classifier_forward(x, prepared)
    out = jax.block_until_ready(out)
    assert out.shape == (batch, num_classes)

    # Tight check vs a reference that mirrors the kernel's bf16/f32 numerics.
    ref_bf16 = reference_forward_bf16(x, params)
    assert jnp.allclose(out, ref_bf16, atol=2e-3, rtol=2e-3)

    # Loose sanity check vs the pure-f32 PyTorch-equivalent forward.  Note:
    # bf16 MXU inputs intentionally diverge from f32 torch; this tolerance is
    # for small hidden sizes only.
    ref_f32 = reference_forward_f32(x, params)
    assert jnp.allclose(out, ref_f32, atol=5e-2, rtol=5e-2)

    print("KERNEL_OK")
</pallas_src>

<mosaic_0001>
module attributes {stable_mosaic.version = 11 : i64} {
  func.func @mlp_kernel(%arg0: i32, %arg1: memref<16x32xbf16, #tpu.memory_space<vmem>>, %arg2: memref<32x32xbf16, #tpu.memory_space<vmem>>, %arg3: memref<1x32xf32, #tpu.memory_space<vmem>>, %arg4: memref<32x32xbf16, #tpu.memory_space<vmem>>, %arg5: memref<1x32xf32, #tpu.memory_space<vmem>>, %arg6: memref<32x8xbf16, #tpu.memory_space<vmem>>, %arg7: memref<1x8xf32, #tpu.memory_space<vmem>>, %arg8: memref<16x8xf32, #tpu.memory_space<vmem>>) attributes {dimension_semantics = [#tpu.dimension_semantics<arbitrary>], iteration_bounds = array<i64: 1>, scalar_prefetch = 0 : i64, scratch_operands = 0 : i64, tpu.core_type = #tpu.core_type<tc>, window_params = [{transform_indices = @transform_0, window_bounds = array<i64: 16, 32>}, {pipeline_mode = #tpu.pipeline_mode<synchronous>, transform_indices = @transform_1, window_bounds = array<i64: 32, 32>}, {pipeline_mode = #tpu.pipeline_mode<synchronous>, transform_indices = @transform_2, window_bounds = array<i64: 1, 32>}, {pipeline_mode = #tpu.pipeline_mode<synchronous>, transform_indices = @transform_3, window_bounds = array<i64: 32, 32>}, {pipeline_mode = #tpu.pipeline_mode<synchronous>, transform_indices = @transform_4, window_bounds = array<i64: 1, 32>}, {pipeline_mode = #tpu.pipeline_mode<synchronous>, transform_indices = @transform_5, window_bounds = array<i64: 32, 8>}, {pipeline_mode = #tpu.pipeline_mode<synchronous>, transform_indices = @transform_6, window_bounds = array<i64: 1, 8>}, {transform_indices = @transform_7, window_bounds = array<i64: 16, 8>}]} {
    %c0 = arith.constant 0 : index
    %c0_0 = arith.constant 0 : index
    %0 = vector.load %arg1[%c0, %c0_0] : memref<16x32xbf16, #tpu.memory_space<vmem>>, vector<16x32xbf16>
    %c0_1 = arith.constant 0 : index
    %c0_2 = arith.constant 0 : index
    %1 = vector.load %arg2[%c0_1, %c0_2] : memref<32x32xbf16, #tpu.memory_space<vmem>>, vector<32x32xbf16>
    %cst = arith.constant dense<0.000000e+00> : vector<16x32xf32>
    %2 = tpu.matmul %0, %1, %cst {dimension_numbers = #tpu.dot_dimension_numbers<[1], [0], [0], [1], [0, 0, 1, 1], [], []>} : vector<16x32xbf16>, vector<32x32xbf16>, vector<16x32xf32> -> vector<16x32xf32>
    %c0_3 = arith.constant 0 : index
    %c0_4 = arith.constant 0 : index
    %3 = vector.load %arg3[%c0_3, %c0_4] : memref<1x32xf32, #tpu.memory_space<vmem>>, vector<1x32xf32>
    %4 = vector.broadcast %3 : vector<1x32xf32> to vector<16x32xf32>
    %5 = arith.addf %2, %4 : vector<16x32xf32>
    %cst_5 = arith.constant 0.000000e+00 : f32
    %6 = vector.broadcast %cst_5 : f32 to vector<16x32xf32>
    %7 = arith.maximumf %5, %6 : vector<16x32xf32>
    %8 = arith.truncf %7 : vector<16x32xf32> to vector<16x32xbf16>
    %c0_6 = arith.constant 0 : index
    %c0_7 = arith.constant 0 : index
    %9 = vector.load %arg4[%c0_6, %c0_7] : memref<32x32xbf16, #tpu.memory_space<vmem>>, vector<32x32xbf16>
    %cst_8 = arith.constant dense<0.000000e+00> : vector<16x32xf32>
    %10 = tpu.matmul %8, %9, %cst_8 {dimension_numbers = #tpu.dot_dimension_numbers<[1], [0], [0], [1], [0, 0, 1, 1], [], []>} : vector<16x32xbf16>, vector<32x32xbf16>, vector<16x32xf32> -> vector<16x32xf32>
    %c0_9 = arith.constant 0 : index
    %c0_10 = arith.constant 0 : index
    %11 = vector.load %arg5[%c0_9, %c0_10] : memref<1x32xf32, #tpu.memory_space<vmem>>, vector<1x32xf32>
    %12 = vector.broadcast %11 : vector<1x32xf32> to vector<16x32xf32>
    %13 = arith.addf %10, %12 : vector<16x32xf32>
    %cst_11 = arith.constant 0.000000e+00 : f32
    %14 = vector.broadcast %cst_11 : f32 to vector<16x32xf32>
    %15 = arith.maximumf %13, %14 : vector<16x32xf32>
    %16 = arith.truncf %15 : vector<16x32xf32> to vector<16x32xbf16>
    %c0_12 = arith.constant 0 : index
    %c0_13 = arith.constant 0 : index
    %17 = vector.load %arg6[%c0_12, %c0_13] : memref<32x8xbf16, #tpu.memory_space<vmem>>, vector<32x8xbf16>
    %cst_14 = arith.constant dense<0.000000e+00> : vector<16x8xf32>
    %18 = tpu.matmul %16, %17, %cst_14 {dimension_numbers = #tpu.dot_dimension_numbers<[1], [0], [0], [1], [0, 0, 1, 1], [], []>} : vector<16x32xbf16>, vector<32x8xbf16>, vector<16x8xf32> -> vector<16x8xf32>
    %c0_15 = arith.constant 0 : index
    %c0_16 = arith.constant 0 : index
    %19 = vector.load %arg7[%c0_15, %c0_16] : memref<1x8xf32, #tpu.memory_space<vmem>>, vector<1x8xf32>
    %20 = vector.broadcast %19 : vector<1x8xf32> to vector<16x8xf32>
    %21 = arith.addf %18, %20 : vector<16x8xf32>
    %c0_17 = arith.constant 0 : index
    %c0_18 = arith.constant 0 : index
    %22 = vector.load %arg8[%c0_17, %c0_18] : memref<16x8xf32, #tpu.memory_space<vmem>>, vector<16x8xf32>
    tpu.vector_store %arg8[%c0_17, %c0_18], %21 {strides = array<i32>} : memref<16x8xf32, #tpu.memory_space<vmem>>, vector<16x8xf32>,
    return
  }
  func.func @transform_0(%arg0: i32) -> (i32, i32) {
    %c0_i32 = arith.constant 0 : i32
    %c0_i32_0 = arith.constant 0 : i32
    return %arg0, %c0_i32 : i32, i32
  }
  func.func @transform_1(%arg0: i32) -> (i32, i32) {
    %c0_i32 = arith.constant 0 : i32
    %c0_i32_0 = arith.constant 0 : i32
    %c0_i32_1 = arith.constant 0 : i32
    return %c0_i32, %c0_i32_0 : i32, i32
  }
  func.func @transform_2(%arg0: i32) -> (i32, i32) {
    %c0_i32 = arith.constant 0 : i32
    %c0_i32_0 = arith.constant 0 : i32
    %c0_i32_1 = arith.constant 0 : i32
    return %c0_i32, %c0_i32_0 : i32, i32
  }
  func.func @transform_3(%arg0: i32) -> (i32, i32) {
    %c0_i32 = arith.constant 0 : i32
    %c0_i32_0 = arith.constant 0 : i32
    %c0_i32_1 = arith.constant 0 : i32
    return %c0_i32, %c0_i32_0 : i32, i32
  }
  func.func @transform_4(%arg0: i32) -> (i32, i32) {
    %c0_i32 = arith.constant 0 : i32
    %c0_i32_0 = arith.constant 0 : i32
    %c0_i32_1 = arith.constant 0 : i32
    return %c0_i32, %c0_i32_0 : i32, i32
  }
  func.func @transform_5(%arg0: i32) -> (i32, i32) {
    %c0_i32 = arith.constant 0 : i32
    %c0_i32_0 = arith.constant 0 : i32
    %c0_i32_1 = arith.constant 0 : i32
    return %c0_i32, %c0_i32_0 : i32, i32
  }
  func.func @transform_6(%arg0: i32) -> (i32, i32) {
    %c0_i32 = arith.constant 0 : i32
    %c0_i32_0 = arith.constant 0 : i32
    %c0_i32_1 = arith.constant 0 : i32
    return %c0_i32, %c0_i32_0 : i32, i32
  }
  func.func @transform_7(%arg0: i32) -> (i32, i32) {
    %c0_i32 = arith.constant 0 : i32
    %c0_i32_0 = arith.constant 0 : i32
    return %arg0, %c0_i32 : i32, i32
  }
}

module attributes {stable_mosaic.version = 11 : i64} {
  func.func @mlp_kernel(%arg0: i32, %arg1: memref<16x32xbf16, #tpu.memory_space<vmem>>, %arg2: memref<32x32xbf16, #tpu.memory_space<vmem>>, %arg3: memref<1x32xf32, #tpu.memory_space<vmem>>, %arg4: memref<32x32xbf16, #tpu.memory_space<vmem>>, %arg5: memref<1x32xf32, #tpu.memory_space<vmem>>, %arg6: memref<32x8xbf16, #tpu.memory_space<vmem>>, %arg7: memref<1x8xf32, #tpu.memory_space<vmem>>, %arg8: memref<16x8xf32, #tpu.memory_space<vmem>>) attributes {dimension_semantics = [#tpu.dimension_semantics<arbitrary>], iteration_bounds = array<i64: 1>, scalar_prefetch = 0 : i64, scratch_operands = 0 : i64, tpu.core_type = #tpu.core_type<tc>, window_params = [{transform_indices = @transform_0, window_bounds = array<i64: 16, 32>}, {pipeline_mode = #tpu.pipeline_mode<synchronous>, transform_indices = @transform_1, window_bounds = array<i64: 32, 32>}, {pipeline_mode = #tpu.pipeline_mode<synchronous>, transform_indices = @transform_2, window_bounds = array<i64: 1, 32>}, {pipeline_mode = #tpu.pipeline_mode<synchronous>, transform_indices = @transform_3, window_bounds = array<i64: 32, 32>}, {pipeline_mode = #tpu.pipeline_mode<synchronous>, transform_indices = @transform_4, window_bounds = array<i64: 1, 32>}, {pipeline_mode = #tpu.pipeline_mode<synchronous>, transform_indices = @transform_5, window_bounds = array<i64: 32, 8>}, {pipeline_mode = #tpu.pipeline_mode<synchronous>, transform_indices = @transform_6, window_bounds = array<i64: 1, 8>}, {transform_indices = @transform_7, window_bounds = array<i64: 16, 8>}]} {
    %c0 = arith.constant 0 : index
    %c0_0 = arith.constant 0 : index
    %0 = vector.load %arg1[%c0, %c0_0] : memref<16x32xbf16, #tpu.memory_space<vmem>>, vector<16x32xbf16>
    %c0_1 = arith.constant 0 : index
    %c0_2 = arith.constant 0 : index
    %1 = vector.load %arg2[%c0_1, %c0_2] : memref<32x32xbf16, #tpu.memory_space<vmem>>, vector<32x32xbf16>
    %cst = arith.constant dense<0.000000e+00> : vector<16x32xf32>
    %2 = tpu.matmul %0, %1, %cst {dimension_numbers = #tpu.dot_dimension_numbers<[1], [0], [0], [1], [0, 0, 1, 1], [], []>} : vector<16x32xbf16>, vector<32x32xbf16>, vector<16x32xf32> -> vector<16x32xf32>
    %c0_3 = arith.constant 0 : index
    %c0_4 = arith.constant 0 : index
    %3 = vector.load %arg3[%c0_3, %c0_4] : memref<1x32xf32, #tpu.memory_space<vmem>>, vector<1x32xf32>
    %4 = vector.broadcast %3 : vector<1x32xf32> to vector<16x32xf32>
    %5 = arith.addf %2, %4 : vector<16x32xf32>
    %cst_5 = arith.constant 0.000000e+00 : f32
    %6 = vector.broadcast %cst_5 : f32 to vector<16x32xf32>
    %7 = arith.maximumf %5, %6 : vector<16x32xf32>
    %8 = arith.truncf %7 : vector<16x32xf32> to vector<16x32xbf16>
    %c0_6 = arith.constant 0 : index
    %c0_7 = arith.constant 0 : index
    %9 = vector.load %arg4[%c0_6, %c0_7] : memref<32x32xbf16, #tpu.memory_space<vmem>>, vector<32x32xbf16>
    %cst_8 = arith.constant dense<0.000000e+00> : vector<16x32xf32>
    %10 = tpu.matmul %8, %9, %cst_8 {dimension_numbers = #tpu.dot_dimension_numbers<[1], [0], [0], [1], [0, 0, 1, 1], [], []>} : vector<16x32xbf16>, vector<32x32xbf16>, vector<16x32xf32> -> vector<16x32xf32>
    %c0_9 = arith.constant 0 : index
    %c0_10 = arith.constant 0 : index
    %11 = vector.load %arg5[%c0_9, %c0_10] : memref<1x32xf32, #tpu.memory_space<vmem>>, vector<1x32xf32>
    %12 = vector.broadcast %11 : vector<1x32xf32> to vector<16x32xf32>
    %13 = arith.addf %10, %12 : vector<16x32xf32>
    %cst_11 = arith.constant 0.000000e+00 : f32
    %14 = vector.broadcast %cst_11 : f32 to vector<16x32xf32>
    %15 = arith.maximumf %13, %14 : vector<16x32xf32>
    %16 = arith.truncf %15 : vector<16x32xf32> to vector<16x32xbf16>
    %c0_12 = arith.constant 0 : index
    %c0_13 = arith.constant 0 : index
    %17 = vector.load %arg6[%c0_12, %c0_13] : memref<32x8xbf16, #tpu.memory_space<vmem>>, vector<32x8xbf16>
    %cst_14 = arith.constant dense<0.000000e+00> : vector<16x8xf32>
    %18 = tpu.matmul %16, %17, %cst_14 {dimension_numbers = #tpu.dot_dimension_numbers<[1], [0], [0], [1], [0, 0, 1, 1], [], []>} : vector<16x32xbf16>, vector<32x8xbf16>, vector<16x8xf32> -> vector<16x8xf32>
    %c0_15 = arith.constant 0 : index
    %c0_16 = arith.constant 0 : index
    %19 = vector.load %arg7[%c0_15, %c0_16] : memref<1x8xf32, #tpu.memory_space<vmem>>, vector<1x8xf32>
    %20 = vector.broadcast %19 : vector<1x8xf32> to vector<16x8xf32>
    %21 = arith.addf %18, %20 : vector<16x8xf32>
    %c0_17 = arith.constant 0 : index
    %c0_18 = arith.constant 0 : index
    %22 = vector.load %arg8[%c0_17, %c0_18] : memref<16x8xf32, #tpu.memory_space<vmem>>, vector<16x8xf32>
    tpu.vector_store %arg8[%c0_17, %c0_18], %21 {strides = array<i32>} : memref<16x8xf32, #tpu.memory_space<vmem>>, vector<16x8xf32>,
    return
  }
  func.func @transform_0(%arg0: i32) -> (i32, i32) {
    %c0_i32 = arith.constant 0 : i32
    %c0_i32_0 = arith.constant 0 : i32
    return %arg0, %c0_i32 : i32, i32
  }
  func.func @transform_1(%arg0: i32) -> (i32, i32) {
    %c0_i32 = arith.constant 0 : i32
    %c0_i32_0 = arith.constant 0 : i32
    %c0_i32_1 = arith.constant 0 : i32
    return %c0_i32, %c0_i32_0 : i32, i32
  }
  func.func @transform_2(%arg0: i32) -> (i32, i32) {
    %c0_i32 = arith.constant 0 : i32
    %c0_i32_0 = arith.constant 0 : i32
    %c0_i32_1 = arith.constant 0 : i32
    return %c0_i32, %c0_i32_0 : i32, i32
  }
  func.func @transform_3(%arg0: i32) -> (i32, i32) {
    %c0_i32 = arith.constant 0 : i32
    %c0_i32_0 = arith.constant 0 : i32
    %c0_i32_1 = arith.constant 0 : i32
    return %c0_i32, %c0_i32_0 : i32, i32
  }
  func.func @transform_4(%arg0: i32) -> (i32, i32) {
    %c0_i32 = arith.constant 0 : i32
    %c0_i32_0 = arith.constant 0 : i32
    %c0_i32_1 = arith.constant 0 : i32
    return %c0_i32, %c0_i32_0 : i32, i32
  }
  func.func @transform_5(%arg0: i32) -> (i32, i32) {
    %c0_i32 = arith.constant 0 : i32
    %c0_i32_0 = arith.constant 0 : i32
    %c0_i32_1 = arith.constant 0 : i32
    return %c0_i32, %c0_i32_0 : i32, i32
  }
  func.func @transform_6(%arg0: i32) -> (i32, i32) {
    %c0_i32 = arith.constant 0 : i32
    %c0_i32_0 = arith.constant 0 : i32
    %c0_i32_1 = arith.constant 0 : i32
    return %c0_i32, %c0_i32_0 : i32, i32
  }
  func.func @transform_7(%arg0: i32) -> (i32, i32) {
    %c0_i32 = arith.constant 0 : i32
    %c0_i32_0 = arith.constant 0 : i32
    return %arg0, %c0_i32 : i32, i32
  }
}

</mosaic_0001>

<bundles_post_ra>
// kernel: tpu_custom_call.1
= control target key start
LH: loop header
LB: loop body
LE: loop exit
PB: predicated region body
PF: predicated region fallthrough
CT: control target
= control target key end

     0   :  { %12 = vsyncpa [#allocation3], 0  ;;  %s451_s0 = inlined_call_operand.vmem [shape: bf16[8,32], index: 0, kind: input, shape index: {}]   ;;  %s452_s1 = inlined_call_operand.vmem [shape: bf16[32,32], index: 1, kind: input, shape index: {}]   ;;  %s453_s2 = inlined_call_operand.hbm [shape: f32[1,32], index: 2, kind: input, shape index: {}]   ;;  %s454_s3 = inlined_call_operand.hbm [shape: bf16[32,32], index: 3, kind: input, shape index: {}]   ;;  %s455_s4 = inlined_call_operand.hbm [shape: f32[1,32], index: 4, kind: input, shape index: {}]   ;;  %s456_s5 = inlined_call_operand.vmem [shape: bf16[32,8], index: 5, kind: input, shape index: {}]   ;;  %s457_s6 = inlined_call_operand.vmem [shape: f32[1,8], index: 6, kind: input, shape index: {}]   ;;  %s458_s7 = inlined_call_operand.hbm [shape: f32[8,8], index: 7, kind: output, shape index: {}]  }
   0x1   :  { %13 = vsyncpa [#allocation6], 0  ;;  %s34_s26 = sshll.u32 %s454_s3, 4  ;;  %s35_s26 = int_to_ptr.hbm [resolvable:$true] %s34_s26 }
   0x2   :  { %14 = vsyncpa [#allocation4], 0  ;;  %s370_s27 = smov [#allocation5]   ;;  %s24_s8 = sshll.u32 %s453_s2, 4  ;;  %s25_s8 = int_to_ptr.hbm [resolvable:$true] %s24_s8 }
   0x3   :  { %s36_s28 = sshll.u32 %s370_s27, 4  ;;  %s371_s9 = smov 64   ;;  %s37_s28 = int_to_ptr.vmem [resolvable:$true] %s36_s28 }
   0x4   :  { %s372_s10 = smov 4   ;;  %s373_s11 = smov [#allocation2]  }
   0x5   :  { %42 = dma.hbm_to_vmem [thread:$0]  %s35_s26, 256, %s37_s28, [#allocation6], %s371_s9, %s371_s9, %s372_s10  }
   0x6   :  { %s26_s12 = sshll.u32 %s373_s11, 4  ;;  %s48_s15 = sshll.u32 %s455_s4, 4  ;;  %s27_s12 = int_to_ptr.vmem [resolvable:$true] %s26_s12  ;;  %s49_s15 = int_to_ptr.hbm [resolvable:$true] %s48_s15 }
   0x7   :  { %29 = dma.hbm_to_vmem [thread:$0]  %s25_s8, 16, %s27_s12, [#allocation3]  }
   0x8   :  { %s374_s3 = smov [#allocation7]  }
   0x9   :  { %s50_s16 = sshll.u32 %s374_s3, 4  ;;  %s51_s16 = int_to_ptr.vmem [resolvable:$true] %s50_s16 }
   0xa   :  { %53 = dma.hbm_to_vmem [thread:$0]  %s49_s15, 16, %s51_s16, [#allocation6]  }
   0xb   :  { %364 = dma.done.wait [#allocation3], 16  }
   0xc   :  { %365 = vsyncadd [#allocation3], 4294967280 }
   0xd   :  { %366 = dma.done.wait [#allocation6], 272  }
   0xe   :  { %367 = vsyncadd [#allocation6], 4294967024  ;;  %v252_v0 = vld [vmem:[%s452_s1 + $0x8] sm:$0xff]  ;;  %v251_v1 = vld [vmem:[%s452_s1] sm:$0xff]  ;;  %vm98_vm0 = vcmask 261120   ;;  %vm196_vm1 = vcmask 64512  }
   0xf   :  { %108 = vmatpush.bf16.msra.mxu0 %v252_v0  ;;  %v250_v2 = vld [vmem:[%s451_s0] sm:$0xff]  ;;  %v254_v3 = vld [vmem:[#allocation5 + $0x8] sm:$0xff]  ;;  %v266_v16 = vld [vmem:[#allocation7] ss:$0 sm:$0xff] }
  0x10   :  { %148 = vmatpush.bf16.msra.mxu1 %v254_v3  ;;  %v253_v4 = vld [vmem:[#allocation5] sm:$0xff]  ;;  %v265_v6 = vld [vmem:[#allocation2] ss:$0 sm:$0xff] }
  0x11   :  { %v256_v13 = vld [vmem:[%s456_s5 + $0x8] sm:$0xff]  ;;  %v255_v14 = vld [vmem:[%s456_s5] sm:$0xff] }
  0x12   :  { %188 = vmatpush.bf16.msra.mxu2 %v256_v13  ;;  %v267_v23 = vld [vmem:[%s457_s6] ss:$0 sm:$0xff] }
  0x13   :  { %109 = vmatpush.bf16.msra.mxu0 %v251_v1 }
  0x14   :  { %149 = vmatpush.bf16.msra.mxu1 %v253_v4 }
  0x16   :  { %231 = vmatmul.msk.bf16.vlgmr.msra.gmra.mxu0 %vm98_vm0, %v250_v2  ;;  %189 = vmatpush.bf16.msra.mxu2 %v255_v14 }
  0x93   :  { %v111_v5 = vpop.f32.mrf.mxu0 }
  0x94   :  { %v112_v7 = vadd.f32 %v265_v6, %v111_v5 }
  0x96   :  { %v116_v10 = vmax.f32 %v112_v7, 0.0 }
  0x9b   :  { %v113_v8 = vpop.f32.mrf.mxu0 }
  0x9c   :  { %v114_v9 = vadd.f32 %v265_v6, %v113_v8 }
  0x9e   :  { %v117_v11 = vmax.f32 %v114_v9, 0.0 }
  0xa0   :  { %v118_v12 = vpack.c.bf16 %v117_v11, %v116_v10 }
  0xa2   :  { %240 = vmatmul.msk.bf16.vlgmr.msra.gmra.mxu1 %vm98_vm0, %v118_v12 }
 0x11f   :  { %v151_v15 = vpop.f32.mrf.mxu1 }
 0x120   :  { %v152_v17 = vadd.f32 %v266_v16, %v151_v15 }
 0x122   :  { %v156_v20 = vmax.f32 %v152_v17, 0.0 }
 0x127   :  { %v153_v18 = vpop.f32.mrf.mxu1 }
 0x128   :  { %v154_v19 = vadd.f32 %v266_v16, %v153_v18 }
 0x12a   :  { %v157_v21 = vmax.f32 %v154_v19, 0.0 }
 0x12c   :  { %v158_v22 = vpack.c.bf16 %v157_v21, %v156_v20 }
 0x12e   :  { %249 = vmatmul.msk.bf16.vlgmr.msra.gmra.mxu2 %vm98_vm0, %v158_v22 }
 0x1b1   :  { %v191_v24 = vpop.f32.mrf.mxu2 }
 0x1b2   :  { %v192_v25 = vadd.f32 %v267_v23, %v191_v24 }
 0x1b4   :  { %197 = vst.msk [vmem:[#allocation8] sm:$0xff] %vm196_vm1, %v192_v25 }
 0x1b9   :  { %v193_v26 = vpop.f32.mrf.mxu2 }
 0x1ba   :  { %v194_v27 = vadd.f32 %v267_v23, %v193_v26 }
 0x1bc   :  { %198 = vst.msk [vmem:[#allocation8 + $0x8] sm:$0xff] %vm196_vm1, %v194_v27 }
 0x1bd   :  { %202 = vsyncadd [#allocation4], 128  ;;  %s205_s26 = sshll.u32 %s458_s7, 4  ;;  %s375_s27 = smov [#allocation8]   ;;  %s206_s26 = int_to_ptr.hbm [resolvable:$true] %s205_s26 }
 0x1be   :  { %s203_s28 = sshll.u32 %s375_s27, 4  ;;  %s376_s29 = smov 128   ;;  %s204_s28 = int_to_ptr.vmem [resolvable:$true] %s203_s28 }
 0x1bf   :  { %s377_s30 = smov 8  }
 0x1c0   :  { %211 = dma.vmem_to_hbm [thread:$0]  %s204_s28, 128, %s206_s26, [#allocation4], %s376_s29, %s376_s29, %s377_s30  }
 0x1c1   :  { %368 = dma.done.wait [#allocation4], 256  }
 0x1c2   :  { %369 = vsyncadd [#allocation4], 4294967040 }
 0x1c3   :  { %216 = vsyncpa [#allocation3], 1 }
 0x1c4   :  { %217 = vsyncpa [#allocation6], 1 }
 0x1c5   :  { %218 = vsyncpa [#allocation4], 1 }

// kernel: tpu_custom_call.1
= control target key start
LH: loop header
LB: loop body
LE: loop exit
PB: predicated region body
PF: predicated region fallthrough
CT: control target
= control target key end

     0   :  { %12 = vsyncpa [#allocation3], 0  ;;  %s451_s0 = inlined_call_operand.vmem [shape: bf16[8,32], index: 0, kind: input, shape index: {}]   ;;  %s452_s1 = inlined_call_operand.vmem [shape: bf16[32,32], index: 1, kind: input, shape index: {}]   ;;  %s453_s2 = inlined_call_operand.hbm [shape: f32[1,32], index: 2, kind: input, shape index: {}]   ;;  %s454_s3 = inlined_call_operand.hbm [shape: bf16[32,32], index: 3, kind: input, shape index: {}]   ;;  %s455_s4 = inlined_call_operand.hbm [shape: f32[1,32], index: 4, kind: input, shape index: {}]   ;;  %s456_s5 = inlined_call_operand.vmem [shape: bf16[32,8], index: 5, kind: input, shape index: {}]   ;;  %s457_s6 = inlined_call_operand.vmem [shape: f32[1,8], index: 6, kind: input, shape index: {}]   ;;  %s458_s7 = inlined_call_operand.hbm [shape: f32[8,8], index: 7, kind: output, shape index: {}]  }
   0x1   :  { %13 = vsyncpa [#allocation6], 0  ;;  %s34_s26 = sshll.u32 %s454_s3, 4  ;;  %s35_s26 = int_to_ptr.hbm [resolvable:$true] %s34_s26 }
   0x2   :  { %14 = vsyncpa [#allocation4], 0  ;;  %s370_s27 = smov [#allocation5]   ;;  %s24_s8 = sshll.u32 %s453_s2, 4  ;;  %s25_s8 = int_to_ptr.hbm [resolvable:$true] %s24_s8 }
   0x3   :  { %s36_s28 = sshll.u32 %s370_s27, 4  ;;  %s371_s9 = smov 64   ;;  %s37_s28 = int_to_ptr.vmem [resolvable:$true] %s36_s28 }
   0x4   :  { %s372_s10 = smov 4   ;;  %s373_s11 = smov [#allocation2]  }
   0x5   :  { %42 = dma.hbm_to_vmem [thread:$0]  %s35_s26, 256, %s37_s28, [#allocation6], %s371_s9, %s371_s9, %s372_s10  }
   0x6   :  { %s26_s12 = sshll.u32 %s373_s11, 4  ;;  %s48_s15 = sshll.u32 %s455_s4, 4  ;;  %s27_s12 = int_to_ptr.vmem [resolvable:$true] %s26_s12  ;;  %s49_s15 = int_to_ptr.hbm [resolvable:$true] %s48_s15 }
   0x7   :  { %29 = dma.hbm_to_vmem [thread:$0]  %s25_s8, 16, %s27_s12, [#allocation3]  }
   0x8   :  { %s374_s3 = smov [#allocation7]  }
   0x9   :  { %s50_s16 = sshll.u32 %s374_s3, 4  ;;  %s51_s16 = int_to_ptr.vmem [resolvable:$true] %s50_s16 }
   0xa   :  { %53 = dma.hbm_to_vmem [thread:$0]  %s49_s15, 16, %s51_s16, [#allocation6]  }
   0xb   :  { %364 = dma.done.wait [#allocation3], 16  }
   0xc   :  { %365 = vsyncadd [#allocation3], 4294967280 }
   0xd   :  { %366 = dma.done.wait [#allocation6], 272  }
   0xe   :  { %367 = vsyncadd [#allocation6], 4294967024  ;;  %v252_v0 = vld [vmem:[%s452_s1 + $0x8] sm:$0xff]  ;;  %v251_v1 = vld [vmem:[%s452_s1] sm:$0xff]  ;;  %vm98_vm0 = vcmask 261120   ;;  %vm196_vm1 = vcmask 64512  }
   0xf   :  { %108 = vmatpush.bf16.msra.mxu0 %v252_v0  ;;  %v250_v2 = vld [vmem:[%s451_s0] sm:$0xff]  ;;  %v254_v3 = vld [vmem:[#allocation5 + $0x8] sm:$0xff]  ;;  %v266_v16 = vld [vmem:[#allocation7] ss:$0 sm:$0xff] }
  0x10   :  { %148 = vmatpush.bf16.msra.mxu1 %v254_v3  ;;  %v253_v4 = vld [vmem:[#allocation5] sm:$0xff]  ;;  %v265_v6 = vld [vmem:[#allocation2] ss:$0 sm:$0xff] }
  0x11   :  { %v256_v13 = vld [vmem:[%s456_s5 + $0x8] sm:$0xff]  ;;  %v255_v14 = vld [vmem:[%s456_s5] sm:$0xff] }
  0x12   :  { %188 = vmatpush.bf16.msra.mxu2 %v256_v13  ;;  %v267_v23 = vld [vmem:[%s457_s6] ss:$0 sm:$0xff] }
  0x13   :  { %109 = vmatpush.bf16.msra.mxu0 %v251_v1 }
  0x14   :  { %149 = vmatpush.bf16.msra.mxu1 %v253_v4 }
  0x16   :  { %231 = vmatmul.msk.bf16.vlgmr.msra.gmra.mxu0 %vm98_vm0, %v250_v2  ;;  %189 = vmatpush.bf16.msra.mxu2 %v255_v14 }
  0x93   :  { %v111_v5 = vpop.f32.mrf.mxu0 }
  0x94   :  { %v112_v7 = vadd.f32 %v265_v6, %v111_v5 }
  0x96   :  { %v116_v10 = vmax.f32 %v112_v7, 0.0 }
  0x9b   :  { %v113_v8 = vpop.f32.mrf.mxu0 }
  0x9c   :  { %v114_v9 = vadd.f32 %v265_v6, %v113_v8 }
  0x9e   :  { %v117_v11 = vmax.f32 %v114_v9, 0.0 }
  0xa0   :  { %v118_v12 = vpack.c.bf16 %v117_v11, %v116_v10 }
  0xa2   :  { %240 = vmatmul.msk.bf16.vlgmr.msra.gmra.mxu1 %vm98_vm0, %v118_v12 }
 0x11f   :  { %v151_v15 = vpop.f32.mrf.mxu1 }
 0x120   :  { %v152_v17 = vadd.f32 %v266_v16, %v151_v15 }
 0x122   :  { %v156_v20 = vmax.f32 %v152_v17, 0.0 }
 0x127   :  { %v153_v18 = vpop.f32.mrf.mxu1 }
 0x128   :  { %v154_v19 = vadd.f32 %v266_v16, %v153_v18 }
 0x12a   :  { %v157_v21 = vmax.f32 %v154_v19, 0.0 }
 0x12c   :  { %v158_v22 = vpack.c.bf16 %v157_v21, %v156_v20 }
 0x12e   :  { %249 = vmatmul.msk.bf16.vlgmr.msra.gmra.mxu2 %vm98_vm0, %v158_v22 }
 0x1b1   :  { %v191_v24 = vpop.f32.mrf.mxu2 }
 0x1b2   :  { %v192_v25 = vadd.f32 %v267_v23, %v191_v24 }
 0x1b4   :  { %197 = vst.msk [vmem:[#allocation8] sm:$0xff] %vm196_vm1, %v192_v25 }
 0x1b9   :  { %v193_v26 = vpop.f32.mrf.mxu2 }
 0x1ba   :  { %v194_v27 = vadd.f32 %v267_v23, %v193_v26 }
 0x1bc   :  { %198 = vst.msk [vmem:[#allocation8 + $0x8] sm:$0xff] %vm196_vm1, %v194_v27 }
 0x1bd   :  { %202 = vsyncadd [#allocation4], 128  ;;  %s205_s26 = sshll.u32 %s458_s7, 4  ;;  %s375_s27 = smov [#allocation8]   ;;  %s206_s26 = int_to_ptr.hbm [resolvable:$true] %s205_s26 }
 0x1be   :  { %s203_s28 = sshll.u32 %s375_s27, 4  ;;  %s376_s29 = smov 128   ;;  %s204_s28 = int_to_ptr.vmem [resolvable:$true] %s203_s28 }
 0x1bf   :  { %s377_s30 = smov 8  }
 0x1c0   :  { %211 = dma.vmem_to_hbm [thread:$0]  %s204_s28, 128, %s206_s26, [#allocation4], %s376_s29, %s376_s29, %s377_s30  }
 0x1c1   :  { %368 = dma.done.wait [#allocation4], 256  }
 0x1c2   :  { %369 = vsyncadd [#allocation4], 4294967040 }
 0x1c3   :  { %216 = vsyncpa [#allocation3], 1 }
 0x1c4   :  { %217 = vsyncpa [#allocation6], 1 }
 0x1c5   :  { %218 = vsyncpa [#allocation4], 1 }

</bundles_post_ra>
